<compile_context>
chip_gen: v7x
topology: tpu7x:2x2x1
jax: 0.10.0
libtpu: 0.0.40
codegen_flags: <defaults>
</compile_context>

<pallas_src>
import functools

import jax
import jax.numpy as jnp
from jax.experimental import pallas as pl
from jax.experimental.pallas import tpu as pltpu


def _round_up(x, m):
    return ((x + m - 1) // m) * m


def _gce_kernel(logits_ref, targets_ref, out_ref, *, q):
    # (TB, C) block of logits; softmax statistics over the class (lane) axis.
    x = logits_ref[...].astype(jnp.float32)
    m = jnp.max(x, axis=-1, keepdims=True)
    e = jnp.exp(x - m)                                   # (TB, C)
    denom = jnp.sum(e, axis=-1, keepdims=True)           # (TB, 1)

    # Gather the target-class exp value with a one-hot mask (no dynamic
    # gather), then normalize only the (TB, 1) gathered value -- the full
    # probs tensor is never materialized.
    # NOTE: out-of-range targets silently yield target_prob == 0 (unlike the
    # PyTorch gather, which would raise); padded rows use target == -1.
    t = targets_ref[...]                                  # (TB, 1) int32
    col = jax.lax.broadcasted_iota(jnp.int32, e.shape, 1)
    target_e = jnp.sum(jnp.where(col == t, e, jnp.float32(0.0)),
                       axis=-1, keepdims=True)            # (TB, 1)
    target_prob = target_e * pl.reciprocal(denom, approx=False)

    # GCE per-sample loss; padded rows (t < 0) contribute zero to the sum.
    loss = (1.0 - jnp.power(target_prob + 1e-7, jnp.float32(q))) / jnp.float32(q)
    loss = jnp.where(t >= 0, loss, jnp.float32(0.0))      # (TB, 1)

    # Per-block partial sum, broadcast to a full (8, 128) tile so the
    # write-back is an unmasked, lane-dense store.
    out_ref[...] = jnp.full(out_ref.shape, jnp.sum(loss), dtype=jnp.float32)


def gce_loss(logits, targets, q=0.7, *, batch_tile=None):
    """Generalized cross-entropy loss. logits: [N, C] float, targets: [N] int."""
    n, c = logits.shape
    targets2d = targets.astype(jnp.int32).reshape(n, 1)

    elt = jnp.dtype(logits.dtype).itemsize
    bytes_per_row = c * elt

    # ---- batch-tile sizing -------------------------------------------------
    # Aim for ~4 MiB of logits per block (big tiles approach the HBM roofline;
    # tiny tiles are grid-overhead bound), floor 128 rows, cap 8192 rows.
    if batch_tile is None:
        rows = (4 * 1024 * 1024) // max(bytes_per_row, 1)
        batch_tile = int(min(max(rows, 128), 8192))

    # VMEM cap: 2x double-buffered input tiles + ~3 f32 compute intermediates
    # must fit comfortably inside v7x's 64 MiB physical VMEM (128 MiB v5e/v6e).
    per_row_vmem = 2 * (bytes_per_row + 4) + 3 * c * 4
    max_rows_by_vmem = max(8, (36 * 1024 * 1024) // per_row_vmem)
    batch_tile = min(int(batch_tile), int(max_rows_by_vmem))
    batch_tile = max(8, (batch_tile // 8) * 8)            # sublane-aligned
    batch_tile = min(batch_tile, _round_up(n, 8))         # don't exceed padded N
    # TODO(synk): for very large C (LLM vocab sizes) where even a few rows blow
    # VMEM, add a class-axis grid dimension with an online-softmax carry.

    # ---- pad N to a multiple of the tile; padded rows masked via target = -1
    n_pad = _round_up(n, batch_tile)
    if n_pad != n:
        logits = jnp.pad(logits, ((0, n_pad - n), (0, 0)))
        targets2d = jnp.pad(targets2d, ((0, n_pad - n), (0, 0)),
                            constant_values=-1)
    num_blocks = n_pad // batch_tile

    # Explicit scoped-VMEM budget so larger tiles still double-buffer cleanly.
    vmem_needed = (2 * batch_tile * (bytes_per_row + 4)   # double-buffered inputs
                   + 3 * batch_tile * c * 4               # f32 intermediates
                   + 2 * 8 * 128 * 4                      # output tiles
                   + (2 << 20))                           # margin
    vmem_limit = int(min(max(vmem_needed, 32 * 1024 * 1024), 56 * 1024 * 1024))

    kernel = functools.partial(_gce_kernel, q=float(q))
    cost = pl.CostEstimate(
        flops=int(5 * n_pad * c),
        transcendentals=int(n_pad * c),
        bytes_accessed=int(n_pad * (bytes_per_row + 4) + num_blocks * 8 * 128 * 4),
    )

    partials = pl.pallas_call(
        kernel,
        out_shape=jax.ShapeDtypeStruct((num_blocks, 8, 128), jnp.float32),
        grid_spec=pltpu.PrefetchScalarGridSpec(
            num_scalar_prefetch=0,
            grid=(num_blocks,),
            in_specs=[
                pl.BlockSpec((batch_tile, c), lambda i: (i, 0)),
                pl.BlockSpec((batch_tile, 1), lambda i: (i, 0)),
            ],
            out_specs=pl.BlockSpec((1, 8, 128), lambda i: (i, 0, 0)),
        ),
        compiler_params=pltpu.CompilerParams(
            # Independent per-block partial sums: batch axis is truly parallel,
            # so the grid can shard across both TensorCores on v7x.
            dimension_semantics=("parallel",),
            vmem_limit_bytes=vmem_limit,
        ),
        cost_estimate=cost,
    )(logits, targets2d)

    # Final reduction (sum of per-block partials / true N) in plain JAX.
    return jnp.sum(partials[:, 0, 0]) / jnp.float32(n)


def _gce_ref(logits, targets, q=0.7):
    probs = jax.nn.softmax(logits.astype(jnp.float32), axis=1)
    tp = probs[jnp.arange(targets.shape[0]), targets]
    loss = (1.0 - (tp + 1e-7) ** q) / q
    return loss.mean()


if __name__ == "__main__":
    key = jax.random.PRNGKey(0)
    k1, k2, k3, k4 = jax.random.split(key, 4)

    # Small shape consistent with the module: batch of 8 samples, 32 classes.
    N, C = 8, 32
    logits = jax.random.normal(k1, (N, C), dtype=jnp.float32)
    targets = jax.random.randint(k2, (N,), 0, C, dtype=jnp.int32)

    out = jax.block_until_ready(gce_loss(logits, targets, q=0.7))
    ref = _gce_ref(logits, targets, q=0.7)
    assert jnp.allclose(out, ref, rtol=1e-5, atol=1e-6), (out, ref)

    # Also exercise the padded, multi-block, parallel-partial-sum path.
    N2, C2 = 200, 48
    logits2 = jax.random.normal(k3, (N2, C2), dtype=jnp.float32)
    targets2 = jax.random.randint(k4, (N2,), 0, C2, dtype=jnp.int32)
    out2 = jax.block_until_ready(gce_loss(logits2, targets2, q=0.7, batch_tile=64))
    ref2 = _gce_ref(logits2, targets2, q=0.7)
    assert jnp.allclose(out2, ref2, rtol=1e-5, atol=1e-6), (out2, ref2)

    print("KERNEL_OK")
</pallas_src>

<mosaic_0001>
module attributes {stable_mosaic.version = 11 : i64} {
  func.func @_gce_kernel(%arg0: i32, %arg1: memref<8x32xf32, #tpu.memory_space<vmem>>, %arg2: memref<8x1xi32, #tpu.memory_space<vmem>>, %arg3: memref<1x8x128xf32, #tpu.memory_space<vmem>>) attributes {dimension_semantics = [#tpu.dimension_semantics<parallel>], iteration_bounds = array<i64: 1>, scalar_prefetch = 0 : i64, scratch_operands = 0 : i64, tpu.core_type = #tpu.core_type<tc>, window_params = [{transform_indices = @transform_0, window_bounds = array<i64: 8, 32>}, {transform_indices = @transform_1, window_bounds = array<i64: 8, 1>}, {transform_indices = @transform_2, window_bounds = array<i64: 1, 8, 128>}]} {
    %c0 = arith.constant 0 : index
    %c0_0 = arith.constant 0 : index
    %0 = vector.load %arg1[%c0, %c0_0] : memref<8x32xf32, #tpu.memory_space<vmem>>, vector<8x32xf32>
    %cst = arith.constant dense<0xFF800000> : vector<8xf32>
    %1 = vector.multi_reduction <maximumf>, %0, %cst [1] : vector<8x32xf32> to vector<8xf32>
    %2 = vector.shape_cast %1 : vector<8xf32> to vector<8x1xf32>
    %3 = vector.broadcast %2 : vector<8x1xf32> to vector<8x32xf32>
    %4 = arith.subf %0, %3 : vector<8x32xf32>
    %5 = math.exp %4 : vector<8x32xf32>
    %cst_1 = arith.constant dense<0.000000e+00> : vector<8xf32>
    %6 = vector.multi_reduction <add>, %5, %cst_1 [1] : vector<8x32xf32> to vector<8xf32>
    %7 = vector.shape_cast %6 : vector<8xf32> to vector<8x1xf32>
    %c0_2 = arith.constant 0 : index
    %c0_3 = arith.constant 0 : index
    %8 = vector.load %arg2[%c0_2, %c0_3] : memref<8x1xi32, #tpu.memory_space<vmem>>, vector<8x1xi32>
    %9 = tpu.iota {dimensions = array<i32: 1>} : vector<8x32xi32>
    %10 = vector.broadcast %8 : vector<8x1xi32> to vector<8x32xi32>
    %11 = arith.cmpi eq, %9, %10 : vector<8x32xi32>
    %cst_4 = arith.constant 0.000000e+00 : f32
    %12 = vector.broadcast %cst_4 : f32 to vector<8x32xf32>
    %13 = arith.select %11, %5, %12 : vector<8x32xi1>, vector<8x32xf32>
    %cst_5 = arith.constant dense<0.000000e+00> : vector<8xf32>
    %14 = vector.multi_reduction <add>, %13, %cst_5 [1] : vector<8x32xf32> to vector<8xf32>
    %15 = vector.shape_cast %14 : vector<8xf32> to vector<8x1xf32>
    %16 = tpu.reciprocal %7 : vector<8x1xf32> -> vector<8x1xf32>
    %17 = arith.mulf %15, %16 : vector<8x1xf32>
    %cst_6 = arith.constant 1.000000e-07 : f32
    %18 = vector.broadcast %cst_6 : f32 to vector<8x1xf32>
    %19 = arith.addf %17, %18 : vector<8x1xf32>
    %cst_7 = arith.constant 0.699999988 : f32
    %20 = vector.broadcast %cst_7 : f32 to vector<8x1xf32>
    %21 = math.powf %19, %20 : vector<8x1xf32>
    %cst_8 = arith.constant 1.000000e+00 : f32
    %22 = vector.broadcast %cst_8 : f32 to vector<8x1xf32>
    %23 = arith.subf %22, %21 : vector<8x1xf32>
    %cst_9 = arith.constant 0.699999988 : f32
    %24 = vector.broadcast %cst_9 : f32 to vector<8x1xf32>
    %25 = arith.divf %23, %24 : vector<8x1xf32>
    %c0_i32 = arith.constant 0 : i32
    %26 = vector.broadcast %c0_i32 : i32 to vector<8x1xi32>
    %27 = arith.cmpi sge, %8, %26 : vector<8x1xi32>
    %cst_10 = arith.constant 0.000000e+00 : f32
    %28 = vector.broadcast %cst_10 : f32 to vector<8x1xf32>
    %29 = arith.select %27, %25, %28 : vector<8x1xi1>, vector<8x1xf32>
    %30 = vector.shape_cast %29 : vector<8x1xf32> to vector<1x8x1xf32>
    %cst_11 = arith.constant dense<0.000000e+00> : vector<1xf32>
    %31 = vector.multi_reduction <add>, %30, %cst_11 [1, 2] : vector<1x8x1xf32> to vector<1xf32>
    %32 = vector.shape_cast %31 : vector<1xf32> to vector<1x1x1xf32>
    %33 = vector.extract %32[0, 0, 0] : f32 from vector<1x1x1xf32>
    %34 = vector.broadcast %33 : f32 to vector<1x8x128xf32>
    %c0_12 = arith.constant 0 : index
    %c0_13 = arith.constant 0 : index
    %c0_14 = arith.constant 0 : index
    %35 = vector.load %arg3[%c0_12, %c0_13, %c0_14] : memref<1x8x128xf32, #tpu.memory_space<vmem>>, vector<1x8x128xf32>
    tpu.vector_store %arg3[%c0_12, %c0_13, %c0_14], %34 {strides = array<i32>} : memref<1x8x128xf32, #tpu.memory_space<vmem>>, vector<1x8x128xf32>,
    return
  }
  func.func @transform_0(%arg0: i32) -> (i32, i32) {
    %c0_i32 = arith.constant 0 : i32
    %c0_i32_0 = arith.constant 0 : i32
    return %arg0, %c0_i32 : i32, i32
  }
  func.func @transform_1(%arg0: i32) -> (i32, i32) {
    %c0_i32 = arith.constant 0 : i32
    %c0_i32_0 = arith.constant 0 : i32
    return %arg0, %c0_i32 : i32, i32
  }
  func.func @transform_2(%arg0: i32) -> (i32, i32, i32) {
    %c0_i32 = arith.constant 0 : i32
    %c0_i32_0 = arith.constant 0 : i32
    %c0_i32_1 = arith.constant 0 : i32
    return %arg0, %c0_i32, %c0_i32_0 : i32, i32, i32
  }
}

</mosaic_0001>

<bundles_post_ra>
// kernel: tpu_custom_call.1
= control target key start
LH: loop header
LB: loop body
LE: loop exit
PB: predicated region body
PF: predicated region fallthrough
CT: control target
= control target key end

     0   :  { %vm13_vm0 = vcmask 261120   ;;  %s171_s0 = inlined_call_operand.vmem [shape: f32[8,32], index: 0, kind: input, shape index: {}]   ;;  %s172_s1 = inlined_call_operand.vmem [shape: s32[8,1], index: 1, kind: input, shape index: {}]   ;;  %s173_s2 = inlined_call_operand.hbm [shape: f32[1,8,128], index: 2, kind: output, shape index: {}]  }
   0x1   :  { %v12_v0 = vld [vmem:[%s171_s0] sm:$0xff] }
   0x2   :  { %7 = vsyncpa [#allocation3], 0  ;;  %v14_v1 = vsel %vm13_vm0, %v12_v0, -inf  ;;  %v133_v2 = vmov 0   ;;  %v23_v3 = vld [vmem:[%s172_s1] sm:$0xff]  ;;  %v24_v7 = vlaneseq  ;;  %vm43_vm8 = vcmask 7168  }
   0x3   :  { %100 = vset.pattern.permute.xlu0 %v133_v2  ;;  %vm41_vm7 = vcmp.ge.s32.totalorder %v23_v3, 0  ;;  %s134_s0 = smov [#allocation2]  }
   0x4   :  { %15 = vmax.xlane.f32.xlu0 %v14_v1  ;;  %v25_v8 = vand.u32 127, %v24_v7  ;;  %s62_s1 = sshll.u32 %s134_s0, 4  ;;  %s63_s1 = int_to_ptr.vmem [resolvable:$true] %s62_s1 }
   0x5   :  { %s109_s14 = scalar_lea.vmem %s63_s1, 128  ;;  %p114_p1 = scmp.lt.s32.totalorder %s63_s1, %s63_s1 }
   0x6   :  { %p110_p0 = scmp.ne.s32.totalorder %s63_s1, %s109_s14  ;;  %p115_p2 = scmp.lt.s32.totalorder %s109_s14, %s109_s14 }
   0x8   :  { %p116_p3 = por %p115_p2, %p114_p1 }
   0xa   :  { %p117_p4 = pnand %p116_p3, %p110_p0 }
  0x1a   :  { %27 = vperm.xlu0 %100, %v23_v3  }
  0x91   :  { %v16_v4 = vpop.xlane.xlu0 %15 }
  0x92   :  { %v17_v5 = vsub.f32 %v12_v0, %v16_v4 }
  0x94   :  { %v18_v6 = vmul.f32 1.442695, %v17_v5 }
  0x96   :  { %101 = vpow2.f32 %v18_v6 }
  0x99   :  { %v28_v9 = vpop.permute.xlu0 %27 }
  0x9a   :  { %vm29_vm1 = vcmp.eq.s32.totalorder %v25_v8, %v28_v9 }
  0xa0   :  { %v102_v10 = vpop.eup %101 }
  0xa1   :  { %v20_v11 = vsel %vm13_vm0, %v102_v10, 0.0  ;;  %v30_v12 = vsel %vm29_vm1, %v102_v10, 0.0 }
  0xa2   :  { %21 = vadd.xlane.f32.xlu1 %v20_v11  ;;  %v31_v13 = vsel %vm13_vm0, %v30_v12, 0.0 }
  0xa6   :  { %32 = vadd.xlane.f32.xlu1 %v31_v13 }
 0x12f   :  { %v22_v14 = vpop.xlane.xlu1 %21 }
 0x130   :  { %103 = vrcp.f32 %v22_v14 }
 0x133   :  { %v33_v16 = vpop.xlane.xlu1 %32 }
 0x13a   :  { %v104_v15 = vpop.eup %103 }
 0x13b   :  { %v35_v17 = vmul.f32 %v104_v15, %v33_v16 }
 0x13d   :  { %v36_v18 = vadd.f32 1e-07, %v35_v17 }
 0x13f   :  { %v74_v19 = vand.u32 2147483647, %v36_v18  ;;  %vm78_vm2 = vcmp.lt.f32.partialorder %v36_v18, 0  ;;  %vm79_vm3 = vcmp.eq.f32.partialorder %v36_v18, 0  ;;  %vm91_vm5 = vcmp.ne.f32.partialorder %v36_v18, %v36_v18 }
 0x140   :  { %vm80_vm6 = vcmp.eq.f32.partialorder %v36_v18, 1065353216 }
 0x141   :  { %105 = vlog2.f32 %v74_v19  ;;  %vm83_vm4 = vcmp.eq.f32.partialorder %v74_v19, 2139095040 }
 0x14b   :  { %v106_v20 = vpop.eup %105 }
 0x14c   :  { %v76_v21 = vmul.f32 0.7, %v106_v20 }
 0x14e   :  { %107 = vpow2.f32 %v76_v21 }
 0x158   :  { %v108_v22 = vpop.eup %107 }
 0x159   :  { %v84_v23 = vsel %vm78_vm2, 2143289344, %v108_v22 }
 0x15a   :  { %v85_v24 = vsel %vm79_vm3, 0, %v84_v23 }
 0x15b   :  { %v90_v25 = vsel %vm83_vm4, 2139095040, %v85_v24 }
 0x15c   :  { %v94_v26 = vsel %vm91_vm5, 2143289344, %v90_v25 }
 0x15d   :  { %v95_v27 = vsel %vm80_vm6, 1065353216, %v94_v26 }
 0x15e   :  { %v38_v28 = vsub.f32 1.0, %v95_v27 }
 0x160   :  { %v40_v29 = vmul.f32 1.4285715, %v38_v28 }
 0x162   :  { %v42_v30 = vsel %vm41_vm7, %v40_v29, 0.0 }
 0x163   :  { %v44_v31 = vsel %vm43_vm8, %v42_v30, 0.0 }
 0x164   :  { %45 = vadd.xlane.f32.xlu1 %v44_v31 }
 0x1f1   :  { %v46_v32 = vpop.xlane.xlu1 %45 }
 0x1f2   :  { %v47_v33 = vrot.slane %v46_v32, 4 }
 0x1f4   :  { %v48_v34 = vadd.f32 %v47_v33, %v46_v32 }
 0x1f6   :  { %v49_v35 = vrot.slane %v48_v34, 2 }
 0x1f8   :  { %v50_v36 = vadd.f32 %v49_v35, %v48_v34 }
 0x1fa   :  { %v51_v37 = vrot.slane %v50_v36, 1 }
 0x1fc   :  { %v52_v38 = vadd.f32 %v51_v37, %v50_v36 }
 0x1fe   :  { %96 = vpush %v52_v38 }
 0x22f   :  { %s97_s13 = spop %96 }
 0x230   :  { %v54_v39 = vstv %s97_s13 }
 0x231   :  { %55 = vst [vmem:[#allocation2] sm:$0xff] %v54_v39 }
 0x232   :  { %120 = shalt.err (!%p117_p4)
}
 0x233   :  { %s121_s17 = scalar_lea.hbm %s173_s2, 128 }
 0x234   :  { %p122_p5 = scmp.ne.s32.totalorder %s173_s2, %s121_s17  ;;  %p125_p6 = scmp.lt.u32.totalorder %s121_s17, %s173_s2 }
 0x236   :  { %p127_p7 = pnand %p125_p6, %p122_p5 }
 0x238   :  { %130 = shalt.err (!%p127_p7)
}
 0x239   :  { %65 = dma.vmem_to_hbm [thread:$0]  %s63_s1, 128, %s173_s2, [#allocation3]  }
 0x23a   :  { %131 = dma.done.wait [#allocation3], 128  }
 0x23b   :  { %132 = vsyncadd [#allocation3], 4294967168 }
 0x23c   :  { %69 = vsyncpa [#allocation3], 1 }

</bundles_post_ra>
